<compile_context>
chip_gen: v6e
topology: v6e:2x2x1
jax: 0.10.0
libtpu: 0.0.40
codegen_flags: <defaults>
</compile_context>

<pallas_src>
import jax
import jax.numpy as jnp
from jax import lax
from jax.experimental import pallas as pl
from jax.experimental.pallas import tpu as pltpu

_BN_EPS = 1e-5
_VMEM_BUDGET_BYTES = 48 * 1024 * 1024   # conservative: < v7x 64 MiB physical VMEM


def _make_resblock_kernel(n, h, w, c_in, c_out, m, guard, wp, has_shortcut):
    """Trace-time-specialized fused ResidualBlock kernel."""
    inv_count = 1.0 / float(n * h * w)       # BN normalizes over (N, H, W)
    c_max = max(c_in, c_out)
    # flat lane offset of each 3x3 tap inside the padded (Hp, Wp) image
    taps = [(kh - 1) * wp + (kw - 1) for kh in range(3) for kw in range(3)]

    def kernel(*refs):
        if has_shortcut:
            (x_ref, mask_ref, wsc_ref, bsc_ref, w1_ref, b1_ref, w2_ref, b2_ref,
             out_ref, stage_ref, col_ref) = refs
        else:
            (x_ref, mask_ref, w1_ref, b1_ref, w2_ref, b2_ref,
             out_ref, stage_ref, col_ref) = refs

        # x_ref    : (Cin, M)  f32   zero-padded images, channel-major flat
        # mask_ref : (1,   M)  f32   1.0 on interior pixels, 0.0 on pad ring
        # w1_ref   : (Cout, 9*Cin)  bf16 (taps folded into contraction dim)
        # w2_ref   : (Cout, 9*Cout) bf16
        # b*_ref   : (Cout, 1) f32
        # out_ref  : (Cout, M) f32
        # stage_ref: (Cmax, G+M+G) bf16 guard-banded staging for shifted reads
        # col_ref  : (9*Cmax, M)   bf16 im2col slab (shared by both convs)
        x = x_ref[...]
        mask = mask_ref[...]

        # ---- shortcut -------------------------------------------------------
        if has_shortcut:            # 1x1 conv over channels (tiny; kept in f32)
            residual = jnp.dot(wsc_ref[...], x,
                               preferred_element_type=jnp.float32) + bsc_ref[...]
        else:                       # nn.Identity: no matmul, no bias   [item 2]
            residual = x

        # ---- BatchNorm2d(affine=False), training-mode stats, one pass -------
        # Pad-ring lanes of x are zero, so plain lane sums equal interior sums.
        mean = jnp.sum(x, axis=1, keepdims=True) * inv_count
        ex2 = jnp.sum(x * x, axis=1, keepdims=True) * inv_count
        var = ex2 - mean * mean                       # biased variance [item 4]
        x_bn = (x - mean) * lax.rsqrt(var + _BN_EPS) * mask   # re-zero pad ring

        # Zero ONLY the guard bands; the slab centre is always fully
        # overwritten before it is read.                              [item 3]
        zeros_g = jnp.zeros((c_max, guard), jnp.bfloat16)
        stage_ref[:, 0:guard] = zeros_g
        stage_ref[:, guard + m:2 * guard + m] = zeros_g

        def conv3x3(src, rows, w_ref, b_ref):
            # Stage the (rows, M) source in bf16, gather its 9 lane-shifted
            # views into the im2col slab, then ONE MXU matmul.    [items 1, 5]
            stage_ref[0:rows, guard:guard + m] = src.astype(jnp.bfloat16)
            for k, d in enumerate(taps):
                col_ref[k * rows:(k + 1) * rows, :] = (
                    stage_ref[0:rows, guard + d:guard + d + m])
            return jnp.dot(w_ref[...], col_ref[0:9 * rows, :],
                           preferred_element_type=jnp.float32) + b_ref[...]

        # ---- conv1 (3x3, pad=1) + Swish --------------------------------------
        y1 = conv3x3(x_bn, c_in, w1_ref, b1_ref)
        act = (y1 * jax.nn.sigmoid(y1)) * mask    # Swish; re-zero ring for conv2

        # ---- conv2 (3x3, pad=1) + residual add -------------------------------
        y2 = conv3x3(act, c_out, w2_ref, b2_ref)
        out_ref[...] = y2 + residual   # ring lanes are junk; sliced off outside

    return kernel


def residual_block_forward(x, params):
    """ResidualBlock.forward.  x: (N, Cin, H, W) f32 -> (N, Cout, H, W) f32."""
    n, c_in, h, w = x.shape
    c_out = int(params["conv1_w"].shape[0])
    hp, wp = h + 2, w + 2
    m = n * hp * wp                                    # flat padded-pixel axis
    guard = max(128, int(pl.cdiv(wp + 1, 128)) * 128)  # >= max |tap shift|
    c_max = max(c_in, c_out)
    has_shortcut = c_in != c_out

    # ---- explicit VMEM footprint check (v7x: 64 MiB phys / 32 MiB scoped,
    # v5e: 16 MiB default scoped limit; limit raised below).      [items 7/8]
    est_bytes = (
        4 * (c_in + 1 + 2 * c_out) * m              # x, mask, out slabs
        + 2 * c_max * (2 * guard + m)               # bf16 staging scratch
        + 2 * 9 * c_max * m                         # bf16 im2col scratch
        + 4 * c_out * (9 * c_in + 9 * c_out + c_in + 4)   # weights / biases
    )
    if 2 * est_bytes > _VMEM_BUDGET_BYTES:          # 2x: runtime buffers/temps
        raise ValueError(
            "ResidualBlock slab exceeds the single-launch VMEM budget; tile the "
            "flat-pixel axis (halo = Wp+1) with BN stats hoisted to a pre-pass.")

    x = x.astype(jnp.float32)

    # ---- layout plumbing: ONE transpose + ONE pad (+ free reshapes)  [item 9]
    x_flat = jnp.pad(jnp.transpose(x, (1, 0, 2, 3)),
                     ((0, 0), (0, 0), (1, 1), (1, 1))).reshape(c_in, m)
    mask = jnp.pad(jnp.ones((n, h, w), jnp.float32),
                   ((0, 0), (1, 1), (1, 1))).reshape(1, m)

    # ---- weights: fold the 9 taps into the contraction dim; bf16 for the MXU
    w1k = jnp.transpose(params["conv1_w"], (0, 2, 3, 1)).reshape(
        c_out, 9 * c_in).astype(jnp.bfloat16)
    b1 = params["conv1_b"].reshape(c_out, 1).astype(jnp.float32)
    w2k = jnp.transpose(params["conv2_w"], (0, 2, 3, 1)).reshape(
        c_out, 9 * c_out).astype(jnp.bfloat16)
    b2 = params["conv2_b"].reshape(c_out, 1).astype(jnp.float32)

    def full(shape):
        return pl.BlockSpec(shape, lambda: (0,) * len(shape))

    inputs = [x_flat, mask]
    in_specs = [full((c_in, m)), full((1, m))]
    if has_shortcut:
        wsc = params["shortcut_w"].reshape(c_out, c_in).astype(jnp.float32)
        bsc = params["shortcut_b"].reshape(c_out, 1).astype(jnp.float32)
        inputs += [wsc, bsc]
        in_specs += [full((c_out, c_in)), full((c_out, 1))]
    inputs += [w1k, b1, w2k, b2]
    in_specs += [full((c_out, 9 * c_in)), full((c_out, 1)),
                 full((c_out, 9 * c_out)), full((c_out, 1))]

    kernel = _make_resblock_kernel(n, h, w, c_in, c_out, m, guard, wp,
                                   has_shortcut)

    out_flat = pl.pallas_call(
        kernel,
        out_shape=jax.ShapeDtypeStruct((c_out, m), jnp.float32),
        in_specs=in_specs,
        out_specs=full((c_out, m)),
        scratch_shapes=[
            pltpu.VMEM((c_max, 2 * guard + m), jnp.bfloat16),   # staging slab
            pltpu.VMEM((9 * c_max, m), jnp.bfloat16),           # im2col slab
        ],
        compiler_params=pltpu.CompilerParams(
            vmem_limit_bytes=_VMEM_BUDGET_BYTES),
    )(*inputs)

    # ---- back to NCHW, dropping the pad ring.  A consumer that accepts the
    # channel-major (C, N, H, W) layout could skip this final transpose.
    out = out_flat.reshape(c_out, n, hp, wp)[:, :, 1:h + 1, 1:w + 1]
    return jnp.transpose(out, (1, 0, 2, 3))


def residual_block_reference(x, params):
    """Pure-JAX f32 reference (same math as the PyTorch module in train mode)."""
    dn = ("NCHW", "OIHW", "NCHW")
    c_in = x.shape[1]
    c_out = params["conv1_w"].shape[0]
    if c_in != c_out:
        residual = lax.conv_general_dilated(
            x, params["shortcut_w"], (1, 1), "VALID", dimension_numbers=dn,
            precision=lax.Precision.HIGHEST) + params["shortcut_b"][None, :, None, None]
    else:
        residual = x
    mean = jnp.mean(x, axis=(0, 2, 3), keepdims=True)
    var = jnp.mean((x - mean) ** 2, axis=(0, 2, 3), keepdims=True)
    y = (x - mean) / jnp.sqrt(var + _BN_EPS)
    y = lax.conv_general_dilated(
        y, params["conv1_w"], (1, 1), ((1, 1), (1, 1)), dimension_numbers=dn,
        precision=lax.Precision.HIGHEST) + params["conv1_b"][None, :, None, None]
    y = y * jax.nn.sigmoid(y)
    y = lax.conv_general_dilated(
        y, params["conv2_w"], (1, 1), ((1, 1), (1, 1)), dimension_numbers=dn,
        precision=lax.Precision.HIGHEST) + params["conv2_b"][None, :, None, None]
    return y + residual


if __name__ == "__main__":
    key = jax.random.PRNGKey(0)

    def make_params(k, c_in, c_out):
        ks = jax.random.split(k, 6)
        p = {
            "conv1_w": 0.2 * jax.random.normal(ks[0], (c_out, c_in, 3, 3), jnp.float32),
            "conv1_b": 0.1 * jax.random.normal(ks[1], (c_out,), jnp.float32),
            "conv2_w": 0.2 * jax.random.normal(ks[2], (c_out, c_out, 3, 3), jnp.float32),
            "conv2_b": 0.1 * jax.random.normal(ks[3], (c_out,), jnp.float32),
        }
        if c_in != c_out:
            p["shortcut_w"] = 0.2 * jax.random.normal(ks[4], (c_out, c_in, 1, 1), jnp.float32)
            p["shortcut_b"] = 0.1 * jax.random.normal(ks[5], (c_out,), jnp.float32)
        return p

    # Tolerance budget: bf16 MXU operands give a statistical worst-case abs
    # error of ~1e-2 here (K=36/72 contractions of ~0.2-magnitude products
    # with 2^-9 operand rounding); 4e-2 atol leaves ~3x headroom.  All
    # elementwise math (BN, Swish, bias, residual) stays f32.
    atol, rtol = 4e-2, 1e-2
    fwd = jax.jit(residual_block_forward)
    n, h, w = 2, 16, 16

    # Case 1: Cin != Cout -> 1x1-conv shortcut path.
    k1, k2, k3, k4 = jax.random.split(key, 4)
    params1 = make_params(k1, 4, 8)
    x1 = jax.random.normal(k2, (n, 4, h, w), jnp.float32)
    out1 = jax.block_until_ready(fwd(x1, params1))
    assert out1.shape == (n, 8, h, w)
    ref1 = residual_block_reference(x1, params1)
    err1 = float(jnp.max(jnp.abs(out1 - ref1)))
    assert jnp.allclose(out1, ref1, atol=atol, rtol=rtol), f"max err {err1}"

    # Case 2: Cin == Cout -> identity shortcut (specialized: no 1x1 matmul).
    params2 = make_params(k3, 4, 4)
    x2 = jax.random.normal(k4, (n, 4, h, w), jnp.float32)
    out2 = jax.block_until_ready(fwd(x2, params2))
    assert out2.shape == (n, 4, h, w)
    ref2 = residual_block_reference(x2, params2)
    err2 = float(jnp.max(jnp.abs(out2 - ref2)))
    assert jnp.allclose(out2, ref2, atol=atol, rtol=rtol), f"max err {err2}"

    print("KERNEL_OK")
</pallas_src>

<mosaic_0001>
module attributes {stable_mosaic.version = 11 : i64} {
  func.func @kernel(%arg0: memref<4x648xf32, #tpu.memory_space<vmem>>, %arg1: memref<1x648xf32, #tpu.memory_space<vmem>>, %arg2: memref<8x4xf32, #tpu.memory_space<vmem>>, %arg3: memref<8x1xf32, #tpu.memory_space<vmem>>, %arg4: memref<8x36xbf16, #tpu.memory_space<vmem>>, %arg5: memref<8x1xf32, #tpu.memory_space<vmem>>, %arg6: memref<8x72xbf16, #tpu.memory_space<vmem>>, %arg7: memref<8x1xf32, #tpu.memory_space<vmem>>, %arg8: memref<8x648xf32, #tpu.memory_space<vmem>>, %arg9: memref<8x904xbf16, #tpu.memory_space<vmem>>, %arg10: memref<72x648xbf16, #tpu.memory_space<vmem>>) attributes {dimension_semantics = [], scalar_prefetch = 0 : i64, scratch_operands = 2 : i64, tpu.core_type = #tpu.core_type<tc>} {
    %c0 = arith.constant 0 : index
    %c0_0 = arith.constant 0 : index
    %0 = vector.load %arg0[%c0, %c0_0] : memref<4x648xf32, #tpu.memory_space<vmem>>, vector<4x648xf32>
    %c0_1 = arith.constant 0 : index
    %c0_2 = arith.constant 0 : index
    %1 = vector.load %arg1[%c0_1, %c0_2] : memref<1x648xf32, #tpu.memory_space<vmem>>, vector<1x648xf32>
    %c0_3 = arith.constant 0 : index
    %c0_4 = arith.constant 0 : index
    %2 = vector.load %arg2[%c0_3, %c0_4] : memref<8x4xf32, #tpu.memory_space<vmem>>, vector<8x4xf32>
    %cst = arith.constant dense<0.000000e+00> : vector<8x648xf32>
    %3 = tpu.matmul %2, %0, %cst {dimension_numbers = #tpu.dot_dimension_numbers<[1], [0], [0], [1], [0, 0, 1, 1], [], []>} : vector<8x4xf32>, vector<4x648xf32>, vector<8x648xf32> -> vector<8x648xf32>
    %c0_5 = arith.constant 0 : index
    %c0_6 = arith.constant 0 : index
    %4 = vector.load %arg3[%c0_5, %c0_6] : memref<8x1xf32, #tpu.memory_space<vmem>>, vector<8x1xf32>
    %5 = vector.broadcast %4 : vector<8x1xf32> to vector<8x648xf32>
    %6 = arith.addf %3, %5 : vector<8x648xf32>
    %cst_7 = arith.constant dense<0.000000e+00> : vector<4xf32>
    %7 = vector.multi_reduction <add>, %0, %cst_7 [1] : vector<4x648xf32> to vector<4xf32>
    %8 = vector.shape_cast %7 : vector<4xf32> to vector<4x1xf32>
    %cst_8 = arith.constant 0.001953125 : f32
    %9 = vector.broadcast %cst_8 : f32 to vector<4x1xf32>
    %10 = arith.mulf %8, %9 : vector<4x1xf32>
    %11 = arith.mulf %0, %0 : vector<4x648xf32>
    %cst_9 = arith.constant dense<0.000000e+00> : vector<4xf32>
    %12 = vector.multi_reduction <add>, %11, %cst_9 [1] : vector<4x648xf32> to vector<4xf32>
    %13 = vector.shape_cast %12 : vector<4xf32> to vector<4x1xf32>
    %cst_10 = arith.constant 0.001953125 : f32
    %14 = vector.broadcast %cst_10 : f32 to vector<4x1xf32>
    %15 = arith.mulf %13, %14 : vector<4x1xf32>
    %16 = arith.mulf %10, %10 : vector<4x1xf32>
    %17 = arith.subf %15, %16 : vector<4x1xf32>
    %18 = vector.broadcast %10 : vector<4x1xf32> to vector<4x648xf32>
    %19 = arith.subf %0, %18 : vector<4x648xf32>
    %cst_11 = arith.constant 9.99999974E-6 : f32
    %20 = vector.broadcast %cst_11 : f32 to vector<4x1xf32>
    %21 = arith.addf %17, %20 : vector<4x1xf32>
    %22 = math.rsqrt %21 : vector<4x1xf32>
    %23 = vector.broadcast %22 : vector<4x1xf32> to vector<4x648xf32>
    %24 = arith.mulf %19, %23 : vector<4x648xf32>
    %25 = vector.broadcast %1 : vector<1x648xf32> to vector<4x648xf32>
    %26 = arith.mulf %24, %25 : vector<4x648xf32>
    %cst_12 = arith.constant 0.000000e+00 : bf16
    %27 = vector.broadcast %cst_12 : bf16 to vector<8x128xbf16>
    %c0_13 = arith.constant 0 : index
    %c0_14 = arith.constant 0 : index
    %28 = vector.load %arg9[%c0_13, %c0_14] : memref<8x904xbf16, #tpu.memory_space<vmem>>, vector<8x128xbf16>
    tpu.vector_store %arg9[%c0_13, %c0_14], %27 {strides = array<i32>} : memref<8x904xbf16, #tpu.memory_space<vmem>>, vector<8x128xbf16>,
    %c0_15 = arith.constant 0 : index
    %c776 = arith.constant 776 : index
    %29 = vector.load %arg9[%c0_15, %c776] : memref<8x904xbf16, #tpu.memory_space<vmem>>, vector<8x128xbf16>
    tpu.vector_store %arg9[%c0_15, %c776], %27 {strides = array<i32>} : memref<8x904xbf16, #tpu.memory_space<vmem>>, vector<8x128xbf16>,
    %30 = arith.truncf %26 : vector<4x648xf32> to vector<4x648xbf16>
    %c0_16 = arith.constant 0 : index
    %c128 = arith.constant 128 : index
    %31 = vector.load %arg9[%c0_16, %c128] : memref<8x904xbf16, #tpu.memory_space<vmem>>, vector<4x648xbf16>
    tpu.vector_store %arg9[%c0_16, %c128], %30 {strides = array<i32>} : memref<8x904xbf16, #tpu.memory_space<vmem>>, vector<4x648xbf16>,
    %c0_17 = arith.constant 0 : index
    %c109 = arith.constant 109 : index
    %32 = vector.load %arg9[%c0_17, %c109] : memref<8x904xbf16, #tpu.memory_space<vmem>>, vector<4x648xbf16>
    %c0_18 = arith.constant 0 : index
    %c0_19 = arith.constant 0 : index
    %33 = vector.load %arg10[%c0_18, %c0_19] : memref<72x648xbf16, #tpu.memory_space<vmem>>, vector<4x648xbf16>
    tpu.vector_store %arg10[%c0_18, %c0_19], %32 {strides = array<i32>} : memref<72x648xbf16, #tpu.memory_space<vmem>>, vector<4x648xbf16>,
    %c0_20 = arith.constant 0 : index
    %c110 = arith.constant 110 : index
    %34 = vector.load %arg9[%c0_20, %c110] : memref<8x904xbf16, #tpu.memory_space<vmem>>, vector<4x648xbf16>
    %c4 = arith.constant 4 : index
    %c0_21 = arith.constant 0 : index
    %35 = vector.load %arg10[%c4, %c0_21] : memref<72x648xbf16, #tpu.memory_space<vmem>>, vector<4x648xbf16>
    tpu.vector_store %arg10[%c4, %c0_21], %34 {strides = array<i32>} : memref<72x648xbf16, #tpu.memory_space<vmem>>, vector<4x648xbf16>,
    %c0_22 = arith.constant 0 : index
    %c111 = arith.constant 111 : index
    %36 = vector.load %arg9[%c0_22, %c111] : memref<8x904xbf16, #tpu.memory_space<vmem>>, vector<4x648xbf16>
    %c8 = arith.constant 8 : index
    %c0_23 = arith.constant 0 : index
    %37 = vector.load %arg10[%c8, %c0_23] : memref<72x648xbf16, #tpu.memory_space<vmem>>, vector<4x648xbf16>
    tpu.vector_store %arg10[%c8, %c0_23], %36 {strides = array<i32>} : memref<72x648xbf16, #tpu.memory_space<vmem>>, vector<4x648xbf16>,
    %c0_24 = arith.constant 0 : index
    %c127 = arith.constant 127 : index
    %38 = vector.load %arg9[%c0_24, %c127] : memref<8x904xbf16, #tpu.memory_space<vmem>>, vector<4x648xbf16>
    %c12 = arith.constant 12 : index
    %c0_25 = arith.constant 0 : index
    %39 = vector.load %arg10[%c12, %c0_25] : memref<72x648xbf16, #tpu.memory_space<vmem>>, vector<4x648xbf16>
    tpu.vector_store %arg10[%c12, %c0_25], %38 {strides = array<i32>} : memref<72x648xbf16, #tpu.memory_space<vmem>>, vector<4x648xbf16>,
    %c0_26 = arith.constant 0 : index
    %c128_27 = arith.constant 128 : index
    %40 = vector.load %arg9[%c0_26, %c128_27] : memref<8x904xbf16, #tpu.memory_space<vmem>>, vector<4x648xbf16>
    %c16 = arith.constant 16 : index
    %c0_28 = arith.constant 0 : index
    %41 = vector.load %arg10[%c16, %c0_28] : memref<72x648xbf16, #tpu.memory_space<vmem>>, vector<4x648xbf16>
    tpu.vector_store %arg10[%c16, %c0_28], %40 {strides = array<i32>} : memref<72x648xbf16, #tpu.memory_space<vmem>>, vector<4x648xbf16>,
    %c0_29 = arith.constant 0 : index
    %c129 = arith.constant 129 : index
    %42 = vector.load %arg9[%c0_29, %c129] : memref<8x904xbf16, #tpu.memory_space<vmem>>, vector<4x648xbf16>
    %c20 = arith.constant 20 : index
    %c0_30 = arith.constant 0 : index
    %43 = vector.load %arg10[%c20, %c0_30] : memref<72x648xbf16, #tpu.memory_space<vmem>>, vector<4x648xbf16>
    tpu.vector_store %arg10[%c20, %c0_30], %42 {strides = array<i32>} : memref<72x648xbf16, #tpu.memory_space<vmem>>, vector<4x648xbf16>,
    %c0_31 = arith.constant 0 : index
    %c145 = arith.constant 145 : index
    %44 = vector.load %arg9[%c0_31, %c145] : memref<8x904xbf16, #tpu.memory_space<vmem>>, vector<4x648xbf16>
    %c24 = arith.constant 24 : index
    %c0_32 = arith.constant 0 : index
    %45 = vector.load %arg10[%c24, %c0_32] : memref<72x648xbf16, #tpu.memory_space<vmem>>, vector<4x648xbf16>
    tpu.vector_store %arg10[%c24, %c0_32], %44 {strides = array<i32>} : memref<72x648xbf16, #tpu.memory_space<vmem>>, vector<4x648xbf16>,
    %c0_33 = arith.constant 0 : index
    %c146 = arith.constant 146 : index
    %46 = vector.load %arg9[%c0_33, %c146] : memref<8x904xbf16, #tpu.memory_space<vmem>>, vector<4x648xbf16>
    %c28 = arith.constant 28 : index
    %c0_34 = arith.constant 0 : index
    %47 = vector.load %arg10[%c28, %c0_34] : memref<72x648xbf16, #tpu.memory_space<vmem>>, vector<4x648xbf16>
    tpu.vector_store %arg10[%c28, %c0_34], %46 {strides = array<i32>} : memref<72x648xbf16, #tpu.memory_space<vmem>>, vector<4x648xbf16>,
    %c0_35 = arith.constant 0 : index
    %c147 = arith.constant 147 : index
    %48 = vector.load %arg9[%c0_35, %c147] : memref<8x904xbf16, #tpu.memory_space<vmem>>, vector<4x648xbf16>
    %c32 = arith.constant 32 : index
    %c0_36 = arith.constant 0 : index
    %49 = vector.load %arg10[%c32, %c0_36] : memref<72x648xbf16, #tpu.memory_space<vmem>>, vector<4x648xbf16>
    tpu.vector_store %arg10[%c32, %c0_36], %48 {strides = array<i32>} : memref<72x648xbf16, #tpu.memory_space<vmem>>, vector<4x648xbf16>,
    %c0_37 = arith.constant 0 : index
    %c0_38 = arith.constant 0 : index
    %50 = vector.load %arg4[%c0_37, %c0_38] : memref<8x36xbf16, #tpu.memory_space<vmem>>, vector<8x36xbf16>
    %c0_39 = arith.constant 0 : index
    %c0_40 = arith.constant 0 : index
    %51 = vector.load %arg10[%c0_39, %c0_40] : memref<72x648xbf16, #tpu.memory_space<vmem>>, vector<36x648xbf16>
    %cst_41 = arith.constant dense<0.000000e+00> : vector<8x648xf32>
    %52 = tpu.matmul %50, %51, %cst_41 {dimension_numbers = #tpu.dot_dimension_numbers<[1], [0], [0], [1], [0, 0, 1, 1], [], []>} : vector<8x36xbf16>, vector<36x648xbf16>, vector<8x648xf32> -> vector<8x648xf32>
    %c0_42 = arith.constant 0 : index
    %c0_43 = arith.constant 0 : index
    %53 = vector.load %arg5[%c0_42, %c0_43] : memref<8x1xf32, #tpu.memory_space<vmem>>, vector<8x1xf32>
    %54 = vector.broadcast %53 : vector<8x1xf32> to vector<8x648xf32>
    %55 = arith.addf %52, %54 : vector<8x648xf32>
    %56 = arith.negf %55 : vector<8x648xf32>
    %57 = math.exp %56 : vector<8x648xf32>
    %cst_44 = arith.constant 1.000000e+00 : f32
    %58 = vector.broadcast %cst_44 : f32 to vector<8x648xf32>
    %59 = arith.addf %58, %57 : vector<8x648xf32>
    %60 = arith.divf %58, %59 : vector<8x648xf32>
    %61 = arith.mulf %55, %60 : vector<8x648xf32>
    %62 = vector.broadcast %1 : vector<1x648xf32> to vector<8x648xf32>
    %63 = arith.mulf %61, %62 : vector<8x648xf32>
    %64 = arith.truncf %63 : vector<8x648xf32> to vector<8x648xbf16>
    %c0_45 = arith.constant 0 : index
    %c128_46 = arith.constant 128 : index
    %65 = vector.load %arg9[%c0_45, %c128_46] : memref<8x904xbf16, #tpu.memory_space<vmem>>, vector<8x648xbf16>
    tpu.vector_store %arg9[%c0_45, %c128_46], %64 {strides = array<i32>} : memref<8x904xbf16, #tpu.memory_space<vmem>>, vector<8x648xbf16>,
    %c0_47 = arith.constant 0 : index
    %c109_48 = arith.constant 109 : index
    %66 = vector.load %arg9[%c0_47, %c109_48] : memref<8x904xbf16, #tpu.memory_space<vmem>>, vector<8x648xbf16>
    %c0_49 = arith.constant 0 : index
    %c0_50 = arith.constant 0 : index
    %67 = vector.load %arg10[%c0_49, %c0_50] : memref<72x648xbf16, #tpu.memory_space<vmem>>, vector<8x648xbf16>
    tpu.vector_store %arg10[%c0_49, %c0_50], %66 {strides = array<i32>} : memref<72x648xbf16, #tpu.memory_space<vmem>>, vector<8x648xbf16>,
    %c0_51 = arith.constant 0 : index
    %c110_52 = arith.constant 110 : index
    %68 = vector.load %arg9[%c0_51, %c110_52] : memref<8x904xbf16, #tpu.memory_space<vmem>>, vector<8x648xbf16>
    %c8_53 = arith.constant 8 : index
    %c0_54 = arith.constant 0 : index
    %69 = vector.load %arg10[%c8_53, %c0_54] : memref<72x648xbf16, #tpu.memory_space<vmem>>, vector<8x648xbf16>
    tpu.vector_store %arg10[%c8_53, %c0_54], %68 {strides = array<i32>} : memref<72x648xbf16, #tpu.memory_space<vmem>>, vector<8x648xbf16>,
    %c0_55 = arith.constant 0 : index
    %c111_56 = arith.constant 111 : index
    %70 = vector.load %arg9[%c0_55, %c111_56] : memref<8x904xbf16, #tpu.memory_space<vmem>>, vector<8x648xbf16>
    %c16_57 = arith.constant 16 : index
    %c0_58 = arith.constant 0 : index
    %71 = vector.load %arg10[%c16_57, %c0_58] : memref<72x648xbf16, #tpu.memory_space<vmem>>, vector<8x648xbf16>
    tpu.vector_store %arg10[%c16_57, %c0_58], %70 {strides = array<i32>} : memref<72x648xbf16, #tpu.memory_space<vmem>>, vector<8x648xbf16>,
    %c0_59 = arith.constant 0 : index
    %c127_60 = arith.constant 127 : index
    %72 = vector.load %arg9[%c0_59, %c127_60] : memref<8x904xbf16, #tpu.memory_space<vmem>>, vector<8x648xbf16>
    %c24_61 = arith.constant 24 : index
    %c0_62 = arith.constant 0 : index
    %73 = vector.load %arg10[%c24_61, %c0_62] : memref<72x648xbf16, #tpu.memory_space<vmem>>, vector<8x648xbf16>
    tpu.vector_store %arg10[%c24_61, %c0_62], %72 {strides = array<i32>} : memref<72x648xbf16, #tpu.memory_space<vmem>>, vector<8x648xbf16>,
    %c0_63 = arith.constant 0 : index
    %c128_64 = arith.constant 128 : index
    %74 = vector.load %arg9[%c0_63, %c128_64] : memref<8x904xbf16, #tpu.memory_space<vmem>>, vector<8x648xbf16>
    %c32_65 = arith.constant 32 : index
    %c0_66 = arith.constant 0 : index
    %75 = vector.load %arg10[%c32_65, %c0_66] : memref<72x648xbf16, #tpu.memory_space<vmem>>, vector<8x648xbf16>
    tpu.vector_store %arg10[%c32_65, %c0_66], %74 {strides = array<i32>} : memref<72x648xbf16, #tpu.memory_space<vmem>>, vector<8x648xbf16>,
    %c0_67 = arith.constant 0 : index
    %c129_68 = arith.constant 129 : index
    %76 = vector.load %arg9[%c0_67, %c129_68] : memref<8x904xbf16, #tpu.memory_space<vmem>>, vector<8x648xbf16>
    %c40 = arith.constant 40 : index
    %c0_69 = arith.constant 0 : index
    %77 = vector.load %arg10[%c40, %c0_69] : memref<72x648xbf16, #tpu.memory_space<vmem>>, vector<8x648xbf16>
    tpu.vector_store %arg10[%c40, %c0_69], %76 {strides = array<i32>} : memref<72x648xbf16, #tpu.memory_space<vmem>>, vector<8x648xbf16>,
    %c0_70 = arith.constant 0 : index
    %c145_71 = arith.constant 145 : index
    %78 = vector.load %arg9[%c0_70, %c145_71] : memref<8x904xbf16, #tpu.memory_space<vmem>>, vector<8x648xbf16>
    %c48 = arith.constant 48 : index
    %c0_72 = arith.constant 0 : index
    %79 = vector.load %arg10[%c48, %c0_72] : memref<72x648xbf16, #tpu.memory_space<vmem>>, vector<8x648xbf16>
    tpu.vector_store %arg10[%c48, %c0_72], %78 {strides = array<i32>} : memref<72x648xbf16, #tpu.memory_space<vmem>>, vector<8x648xbf16>,
    %c0_73 = arith.constant 0 : index
    %c146_74 = arith.constant 146 : index
    %80 = vector.load %arg9[%c0_73, %c146_74] : memref<8x904xbf16, #tpu.memory_space<vmem>>, vector<8x648xbf16>
    %c56 = arith.constant 56 : index
    %c0_75 = arith.constant 0 : index
    %81 = vector.load %arg10[%c56, %c0_75] : memref<72x648xbf16, #tpu.memory_space<vmem>>, vector<8x648xbf16>
    tpu.vector_store %arg10[%c56, %c0_75], %80 {strides = array<i32>} : memref<72x648xbf16, #tpu.memory_space<vmem>>, vector<8x648xbf16>,
    %c0_76 = arith.constant 0 : index
    %c147_77 = arith.constant 147 : index
    %82 = vector.load %arg9[%c0_76, %c147_77] : memref<8x904xbf16, #tpu.memory_space<vmem>>, vector<8x648xbf16>
    %c64 = arith.constant 64 : index
    %c0_78 = arith.constant 0 : index
    %83 = vector.load %arg10[%c64, %c0_78] : memref<72x648xbf16, #tpu.memory_space<vmem>>, vector<8x648xbf16>
    tpu.vector_store %arg10[%c64, %c0_78], %82 {strides = array<i32>} : memref<72x648xbf16, #tpu.memory_space<vmem>>, vector<8x648xbf16>,
    %c0_79 = arith.constant 0 : index
    %c0_80 = arith.constant 0 : index
    %84 = vector.load %arg6[%c0_79, %c0_80] : memref<8x72xbf16, #tpu.memory_space<vmem>>, vector<8x72xbf16>
    %c0_81 = arith.constant 0 : index
    %c0_82 = arith.constant 0 : index
    %85 = vector.load %arg10[%c0_81, %c0_82] : memref<72x648xbf16, #tpu.memory_space<vmem>>, vector<72x648xbf16>
    %cst_83 = arith.constant dense<0.000000e+00> : vector<8x648xf32>
    %86 = tpu.matmul %84, %85, %cst_83 {dimension_numbers = #tpu.dot_dimension_numbers<[1], [0], [0], [1], [0, 0, 1, 1], [], []>} : vector<8x72xbf16>, vector<72x648xbf16>, vector<8x648xf32> -> vector<8x648xf32>
    %c0_84 = arith.constant 0 : index
    %c0_85 = arith.constant 0 : index
    %87 = vector.load %arg7[%c0_84, %c0_85] : memref<8x1xf32, #tpu.memory_space<vmem>>, vector<8x1xf32>
    %88 = vector.broadcast %87 : vector<8x1xf32> to vector<8x648xf32>
    %89 = arith.addf %86, %88 : vector<8x648xf32>
    %90 = arith.addf %89, %6 : vector<8x648xf32>
    %c0_86 = arith.constant 0 : index
    %c0_87 = arith.constant 0 : index
    %91 = vector.load %arg8[%c0_86, %c0_87] : memref<8x648xf32, #tpu.memory_space<vmem>>, vector<8x648xf32>
    tpu.vector_store %arg8[%c0_86, %c0_87], %90 {strides = array<i32>} : memref<8x648xf32, #tpu.memory_space<vmem>>, vector<8x648xf32>,
    return
  }
}

</mosaic_0001>

<bundles_post_ra>
// kernel: residual_block_forward.1
= control target key start
LH: loop header
LB: loop body
LE: loop exit
PB: predicated region body
PF: predicated region fallthrough
CT: control target
= control target key end

     0   :  { %vm51_vm0 = vcmask 1043456   ;;  %vm289_vm1 = vcmask 60416   ;;  %vm384_vm2 = vcmask 1043520   ;;  %v1714_v34 = vmov 0   ;;  %s1717_s12 = smov 19   ;;  %s1719_s13 = smov 111   ;;  %s2223_s0 = inlined_call_operand.vmem [shape: f32[4,648], index: 0, kind: input, shape index: {}]   ;;  %s2224_s1 = inlined_call_operand.vmem [shape: f32[1,648], index: 1, kind: input, shape index: {}]   ;;  %s2225_s2 = inlined_call_operand.vmem [shape: f32[8,4], index: 2, kind: input, shape index: {}]   ;;  %s2226_s5 = inlined_call_operand.vmem [shape: f32[8,1], index: 5, kind: input, shape index: {}]   ;;  %s2227_s4 = inlined_call_operand.vmem [shape: bf16[8,36], index: 4, kind: input, shape index: {}]   ;;  %s2228_s7 = inlined_call_operand.vmem [shape: f32[8,1], index: 7, kind: input, shape index: {}]   ;;  %s2229_s3 = inlined_call_operand.vmem [shape: f32[8,1], index: 3, kind: input, shape index: {}]   ;;  %s2230_s6 = inlined_call_operand.vmem [shape: bf16[8,72], index: 6, kind: input, shape index: {}]   ;;  %s2231_s8 = inlined_call_operand.vmem [shape: f32[8,648], index: 8, kind: output, shape index: {}]  }
   0x1   :  { %v1773_v0 = vld [vmem:[%s2223_s0] sm:$0xff]  ;;  %v1778_v1 = vld [vmem:[%s2223_s0 + $0x8] sm:$0xff]  ;;  %v1783_v2 = vld [vmem:[%s2223_s0 + $0x10] sm:$0xff]  ;;  %383 = vst [vmem:[#allocation2] sm:$0xf] %v1714_v34  ;;  %1645 = vset.pattern.permute.xlu0 %v1714_v34  ;;  %1646 = vset.pattern.permute.xlu1 %v1714_v34  ;;  %vm385_vm3 = vcmask 64516   ;;  %v327_v43 = vlaneseq }
   0x2   :  { %v44_v3 = vcombine.high %v1773_v0, %v1773_v0  ;;  %v45_v4 = vcombine.high %v1778_v1, %v1778_v1  ;;  %v46_v5 = vcombine.high %v1783_v2, %v1783_v2  ;;  %v280_v6 = vsel %vm51_vm0, %v1773_v0, 0.0  ;;  %vm386_vm4 = vmor %vm385_vm3, %vm384_vm2  ;;  %v33_v49 = vld [vmem:[%s2224_s1] sm:$0x3f]  ;;  %s1716_s1 = smov 109   ;;  %s1720_s14 = smov 17  }
   0x3   :  { %v295_v7 = vmul.f32 %v1773_v0, %v1773_v0  ;;  %v296_v8 = vmul.f32 %v1778_v1, %v1778_v1  ;;  %v283_v10 = vsel %vm51_vm0, %v1778_v1, 0.0  ;;  %v297_v11 = vmul.f32 %v1783_v2, %v1783_v2  ;;  %387 = vst.msk [vmem:[#allocation2 + $0x18] sm:$0xff] %vm386_vm4, %v1714_v34  ;;  %s1721_s17 = smov 110   ;;  %s1723_s18 = smov 1  }
   0x4   :  { %v281_v9 = vsel %vm51_vm0, %v44_v3, 0.0  ;;  %1547 = vmatprep.subr.msk.mxu1 %vm51_vm0, %v44_v3  ;;  %1553 = vmatprep.subr.msk.mxu0 %vm51_vm0, %v46_v5  ;;  %v285_v16 = vsel %vm51_vm0, %v45_v4, 0.0  ;;  %v287_v20 = vsel %vm51_vm0, %v1783_v2, 0.0  ;;  %v290_v25 = vsel %vm289_vm1, %v46_v5, 0.0  ;;  %s1724_s19 = smov 127  }
   0x5   :  { %v282_v12 = vadd.f32 %v281_v9, %v280_v6  ;;  %v301_v13 = vcombine.high %v295_v7, %v295_v7  ;;  %v302_v14 = vcombine.high %v296_v8, %v296_v8  ;;  %v307_v15 = vsel %vm51_vm0, %v295_v7, 0.0  ;;  %1548 = vmatpush1.msk.msra.mxu1 %vm51_vm0, %v1773_v0  ;;  %1554 = vmatpush1.msk.msra.mxu0 %vm51_vm0, %v1783_v2 }
   0x6   :  { %1550 = vmatprep.subr.msk.mxu1 %vm51_vm0, %v45_v4  ;;  %v310_v19 = vsel %vm51_vm0, %v296_v8, 0.0  ;;  %v303_v23 = vcombine.high %v297_v11, %v297_v11  ;;  %v314_v28 = vsel %vm51_vm0, %v297_v11, 0.0  ;;  %v1715_v41 = vmov 839922192  }
   0x7   :  { %v284_v17 = vadd.f32 %v283_v10, %v282_v12  ;;  %v308_v18 = vsel %vm51_vm0, %v301_v13, 0.0  ;;  %v312_v24 = vsel %vm51_vm0, %v302_v14, 0.0  ;;  %v325_v42 = vunpack.c.l.s4 %v1715_v41 }
   0x8   :  { %v309_v21 = vadd.f32 %v308_v18, %v307_v15  ;;  %v316_v31 = vsel %vm289_vm1, %v303_v23, 0.0  ;;  %v328_v46 = vshrl.u32 %v327_v43, 7  ;;  %vm423_vm5 = vcmask 1041408  }
   0x9   :  { %v286_v22 = vadd.f32 %v285_v16, %v284_v17  ;;  %v326_v45 = vunpack.c.0.s8 %v325_v42  ;;  %vm424_vm6 = vcmask 62468   ;;  %vm47_vm8 = vcmask 31744  }
   0xa   :  { %v311_v26 = vadd.f32 %v310_v19, %v309_v21  ;;  %v352_v47 = vsub.s32 0, %v328_v46  ;;  %v356_v48 = vsub.s32 1, %v328_v46  ;;  %v360_v50 = vsub.s32 2, %v328_v46  ;;  %vm1847_vm7 = vmor %vm424_vm6, %vm423_vm5 }
   0xb   :  { %v288_v27 = vadd.f32 %v287_v20, %v286_v22  ;;  %v364_v51 = vsub.s32 3, %v328_v46  ;;  %v368_v52 = vsub.s32 4, %v328_v46  ;;  %v372_v53 = vsub.s32 5, %v328_v46 }
   0xc   :  { %v313_v29 = vadd.f32 %v312_v24, %v311_v26  ;;  %v329_v54 = vsub.s32 %v326_v45, %v328_v46  ;;  %v1825_v55 = vrot.slane %v33_v49, %v352_v47  ;;  %v1827_v56 = vrot.slane %v33_v49, %v356_v48 }
   0xd   :  { %v291_v30 = vadd.f32 %v290_v25, %v288_v27  ;;  %v1829_v57 = vrot.slane %v33_v49, %v360_v50  ;;  %v1831_v58 = vrot.slane %v33_v49, %v364_v51  ;;  %v1833_v59 = vrot.slane %v33_v49, %v368_v52 }
   0xe   :  { %v315_v32 = vadd.f32 %v314_v28, %v313_v29  ;;  %v1835_v60 = vrot.slane %v33_v49, %v372_v53  ;;  %v374_v63 = vcombine.low %v1825_v55, %v1827_v56  ;;  %v1718_v24 = vmov 0.0  }
   0xf   :  { %292 = vadd.xlane.f32.xlu0 %v291_v30  ;;  %v375_v3 = vcombine.low %v1829_v57, %v1831_v58  ;;  %128 = vmatprep.mubr.f32.mxu1 %v1718_v24  ;;  %v34_v30 = vld [vmem:[%s2225_s2] sm:$0xff]  ;;  %s1722_s2 = smov 18   ;;  %vm661_vm9 = vcmask 891904   ;;  %vm604_vm10 = vcmask 908288   ;;  %vm484_vm11 = vcmask 1043458  }
  0x10   :  { %v317_v33 = vadd.f32 %v316_v31, %v315_v32  ;;  %v376_v4 = vcombine.low %v1833_v59, %v1835_v60  ;;  %270 = vmatprep.mubr.f32.mxu0 %v1718_v24  ;;  %1549 = vmatmul.mubr.msk.f32.vlgmr.msra.gmra.mxu1 %vm47_vm8, %v34_v30  ;;  %vm485_vm12 = vcmask 64518   ;;  %vm634_vm13 = vcmask 900096  }
  0x11   :  { %1555 = vmatmul.mubr.msk.f32.vlgmr.msra.gmra.mxu0 %vm47_vm8, %v34_v30  ;;  %1551 = vmatpush1.msk.msra.mxu1 %vm51_vm0, %v1778_v1  ;;  %vm1910_vm14 = vmor %vm485_vm12, %vm484_vm11  ;;  %vm444_vm15 = vcmask 154624   ;;  %vm474_vm1 = vcmask 146432   ;;  %vm504_vm2 = vcmask 138240   ;;  %vm577_vm4 = vcmask 1039360  }
  0x12   :  { %199 = vmatprep.mubr.f32.mxu1 %v1718_v24  ;;  %864 = vmatprep.mubr.bf16.mxu0 %v1714_v34  ;;  %vm540_vm6 = vcmask 7168  }
  0x13   :  { %318 = vadd.xlane.f32.xlu0 %v317_v33 }
  0x14   :  { %1552 = vmatmul.mubr.msk.f32.vlgmr.msra.gmra.mxu1 %vm47_vm8, %v34_v30 }
  0x15   :  { %823 = vmatprep.mubr.bf16.mxu1 %v1714_v34 }
  0x98   :  { %v293_v35 = vpop.xlane.xlu0 %292 }
  0x99   :  { %v294_v36 = vmul.f32 0.001953125, %v293_v35 }
  0x9b   :  { %v321_v38 = vmul.f32 %v294_v36, %v294_v36  ;;  %v330_v61 = vrot.slane %v294_v36, %v329_v54 }
  0x9c   :  { %v319_v37 = vpop.xlane.xlu0 %318 }
  0x9d   :  { %v320_v39 = vmul.f32 0.001953125, %v319_v37  ;;  %v332_v5 = vsub.f32 %v1773_v0, %v330_v61  ;;  %v333_v6 = vsub.f32 %v1778_v1, %v330_v61  ;;  %v334_v7 = vsub.f32 %v1783_v2, %v330_v61 }
  0x9f   :  { %v322_v40 = vsub.f32 %v320_v39, %v321_v38 }
  0xa1   :  { %v335_v44 = vadd.f32 1e-05, %v322_v40 }
  0xa3   :  { %1688 = vrsqrt.f32 %v335_v44 }
  0xb0   :  { %v1689_v62 = vpop.eup %1688 }
  0xb1   :  { %v344_v8 = vrot.slane %v1689_v62, %v329_v54 }
  0xb3   :  { %v346_v9 = vmul.f32 %v344_v8, %v332_v5  ;;  %v347_v10 = vmul.f32 %v344_v8, %v333_v6  ;;  %v348_v11 = vmul.f32 %v344_v8, %v334_v7  ;;  %v688_v8 = vld [vmem:[%s2226_s5] sm:$0xff] }
  0xb5   :  { %v380_v12 = vmul.f32 %v374_v63, %v346_v9  ;;  %v381_v13 = vmul.f32 %v375_v3, %v347_v10  ;;  %v382_v14 = vmul.f32 %v376_v4, %v348_v11 }
  0xb7   :  { %v391_v15 = vcombine.high %v380_v12, %v380_v12  ;;  %v392_v16 = vcombine.high %v381_v13, %v381_v13  ;;  %v393_v17 = vcombine.high %v382_v14, %v382_v14 }
  0xb9   :  { %v1628_v0 = vpack.c.bf16 %v391_v15, %v380_v12  ;;  %v1629_v19 = vpack.c.bf16 %v392_v16, %v381_v13  ;;  %v1630_v2 = vpack.c.bf16 %v393_v17, %v382_v14 }
  0xbb   :  { %421 = vst [vmem:[#allocation2 + $0x4] sm:$0x33] %v1628_v0  ;;  %422 = vst [vmem:[#allocation2 + $0xc] sm:$0x33] %v1629_v19 }
  0xbc   :  { %426 = vst.msk [vmem:[#allocation2 + $0x14] sm:$0x33] %vm1847_vm7, %v1630_v2 }
  0xc2   :  { %v645_v21 = vld [vmem:[#allocation2 + $0x4] sm:$0x33]  ;;  %v646_v22 = vld [vmem:[#allocation2 + $0xc] sm:$0x33] }
  0xc3   :  { %v647_v20 = vld [vmem:[#allocation2 + $0x14] sm:$0x33]  ;;  %651 = vrot.lane.b32.xlu1 %v645_v21, %s1716_s1  ;;  %v428_v23 = vld [vmem:[#allocation2 + $0x8] sm:$0x33]  ;;  %v455_v38 = vld [vmem:[#allocation2] sm:$0x33] }
  0xc4   :  { %655 = vrot.lane.b32.xlu0 %v647_v20, %s1716_s1  ;;  %v588_v25 = vld [vmem:[#allocation2 + $0x4] sm:$0x33]  ;;  %v589_v28 = vld [vmem:[#allocation2 + $0xc] sm:$0x33]  ;;  %v617_v31 = vld [vmem:[#allocation2 + $0x14] sm:$0x33] }
  0xc5   :  { %v489_v26 = vld [vmem:[#allocation2 + $0x8] sm:$0x33]  ;;  %v554_v35 = vld [vmem:[#allocation2 + $0x14] sm:$0x33]  ;;  %v623_v36 = vrot.slane %v617_v31, 6  ;;  %v461_v39 = vrot.slane %v455_v38, 6 }
  0xc6   :  { %v615_v27 = vld [vmem:[#allocation2 + $0x4] sm:$0x33]  ;;  %v553_v33 = vld [vmem:[#allocation2 + $0xc] sm:$0x33]  ;;  %557 = vst.msk [vmem:[#allocation3 + $0x40] sm:$0x33] %vm1847_vm7, %v554_v35 }
  0xc7   :  { %653 = vrot.lane.b32.xlu1 %v646_v22, %s1716_s1  ;;  %v621_v29 = vrot.slane %v615_v27, 6  ;;  %v552_v32 = vld [vmem:[#allocation2 + $0x4] sm:$0x33]  ;;  %556 = vst [vmem:[#allocation3 + $0x38] sm:$0x33] %v553_v33 }
  0xc8   :  { %435 = vrot.lane.b32.xlu0 %v428_v23, %s1717_s12  ;;  %555 = vst [vmem:[#allocation3 + $0x30] sm:$0x33] %v552_v32  ;;  %v590_v37 = vld [vmem:[#allocation2 + $0x14] sm:$0x33]  ;;  %v427_v40 = vld [vmem:[#allocation2] sm:$0x33] }
  0xc9   :  { %v457_v41 = vld [vmem:[#allocation2 + $0x10] sm:$0x33]  ;;  %v515_v43 = vld [vmem:[#allocation2] sm:$0x33]  ;;  %v456_v63 = vld [vmem:[#allocation2 + $0x8] sm:$0x33] }
  0xca   :  { %v463_v1 = vrot.slane %v457_v41, 6  ;;  %v429_v42 = vld [vmem:[#allocation2 + $0x10] sm:$0x33]  ;;  %v523_v44 = vrot.slane %v515_v43, 6  ;;  %v488_v45 = vld [vmem:[#allocation2] sm:$0x33] }
  0xcb   :  { %594 = vrot.lane.b32.xlu1 %v588_v25, %s1719_s13  ;;  %v517_v46 = vld [vmem:[#allocation2 + $0x10] sm:$0x33]  ;;  %v558_v49 = vld [vmem:[#allocation2 + $0x4] sm:$0x33]  ;;  %v462_v3 = vrot.slane %v456_v63, 6 }
  0xcc   :  { %496 = vrot.lane.b32.xlu0 %v489_v26, %s1720_s14  ;;  %v525_v47 = vrot.slane %v517_v46, 6  ;;  %v490_v48 = vld [vmem:[#allocation2 + $0x10] sm:$0x33]  ;;  %v564_v50 = vrot.slane %v558_v49, 6  ;;  %v516_v4 = vld [vmem:[#allocation2 + $0x8] sm:$0x33] }
  0xcd   :  { %v559_v51 = vld [vmem:[#allocation2 + $0xc] sm:$0x33]  ;;  %v560_v53 = vld [vmem:[#allocation2 + $0x14] sm:$0x33]  ;;  %v524_v5 = vrot.slane %v516_v4, 6 }
  0xce   :  { %v565_v52 = vrot.slane %v559_v51, 6  ;;  %v566_v54 = vrot.slane %v560_v53, 6  ;;  %v616_v61 = vld [vmem:[#allocation2 + $0xc] sm:$0x33]  ;;  %v518_v6 = vld [vmem:[#allocation2 + $0x18] sm:$0x3] }
  0xcf   :  { %596 = vrot.lane.b32.xlu1 %v589_v28, %s1719_s13  ;;  %v622_v62 = vrot.slane %v616_v61, 6  ;;  %v526_v7 = vrot.slane %v518_v6, 6 }
  0xd0   :  { %624 = vrot.lane.b32.xlu0 %v621_v29, %s1721_s17 }
  0xd3   :  { %598 = vrot.lane.b32.xlu1 %v590_v37, %s1719_s13 }
  0xd4   :  { %628 = vrot.lane.b32.xlu0 %v623_v36, %s1721_s17 }
  0xd7   :  { %433 = vrot.lane.b32.xlu1 %v427_v40, %s1717_s12 }
  0xd8   :  { %464 = vrot.lane.b32.xlu0 %v461_v39, %s1722_s2 }
  0xdb   :  { %437 = vrot.lane.b32.xlu1 %v429_v42, %s1717_s12 }
  0xdc   :  { %468 = vrot.lane.b32.xlu0 %v463_v1, %s1722_s2 }
  0xdf   :  { %494 = vrot.lane.b32.xlu1 %v488_v45, %s1720_s14 }
  0xe0   :  { %527 = vrot.lane.b32.xlu0 %v523_v44, %s1723_s18 }
  0xe3   :  { %498 = vrot.lane.b32.xlu1 %v490_v48, %s1720_s14 }
  0xe4   :  { %531 = vrot.lane.b32.xlu0 %v525_v47, %s1723_s18 }
  0xe7   :  { %567 = vrot.lane.b32.xlu1 %v564_v50, %s1724_s19 }
  0xe8   :  { %691 = vperm.xlu0 %1645, %v688_v8  }
  0xeb   :  { %569 = vrot.lane.b32.xlu1 %v565_v52, %s1724_s19 }
  0xef   :  { %571 = vrot.lane.b32.xlu1 %v566_v54, %s1724_s19 }
  0xf3   :  { %626 = vrot.lane.b32.xlu1 %v622_v62, %s1721_s17 }
  0xf7   :  { %466 = vrot.lane.b32.xlu1 %v462_v3, %s1722_s2 }
  0xfb   :  { %529 = vrot.lane.b32.xlu1 %v524_v5, %s1723_s18 }
  0xff   :  { %533 = vrot.lane.b32.xlu1 %v526_v7, %s1723_s18 }
 0x135   :  { %v652_v10 = vpop.permute.xlu1 %651 }
 0x136   :  { %v656_v9 = vpop.permute.xlu0 %655  ;;  %v657_v15 = vrot.slane %v652_v10, 4 }
 0x137   :  { %v659_v11 = vrot.slane %v656_v9, 4 }
 0x139   :  { %v665_v12 = vsel %vm661_vm9, %v656_v9, %v659_v11  ;;  %v654_v13 = vpop.permute.xlu1 %653 }
 0x13a   :  { %671 = vst.msk [vmem:[#allocation3 + $0x70] sm:$0x33] %vm1847_vm7, %v665_v12  ;;  %v1896_v14 = vpop.permute.xlu0 %435  ;;  %v658_v16 = vrot.slane %v654_v13, 4 }
 0x13b   :  { %v440_v47 = vrot.slane %v1896_v14, 4 }
 0x13c   :  { %v660_v17 = vsel %vm51_vm0, %v657_v15, %v658_v16  ;;  %v663_v0 = vsel %vm51_vm0, %v658_v16, %v659_v11 }
 0x13d   :  { %v662_v19 = vsel %vm661_vm9, %v652_v10, %v660_v17  ;;  %v664_v2 = vsel %vm661_vm9, %v654_v13, %v663_v0  ;;  %v595_v20 = vpop.permute.xlu1 %594 }
 0x13e   :  { %v1902_v21 = vpop.permute.xlu0 %496  ;;  %669 = vst [vmem:[#allocation3 + $0x60] sm:$0x33] %v662_v19  ;;  %670 = vst [vmem:[#allocation3 + $0x68] sm:$0x33] %v664_v2  ;;  %v600_v24 = vrot.slane %v595_v20, 4 }
 0x13f   :  { %v501_v5 = vrot.slane %v1902_v21, 4 }
 0x141   :  { %v597_v22 = vpop.permute.xlu1 %596 }
 0x142   :  { %v1904_v23 = vpop.permute.xlu0 %624  ;;  %v601_v25 = vrot.slane %v597_v22, 4 }
 0x144   :  { %v603_v26 = vsel %vm51_vm0, %v600_v24, %v601_v25 }
 0x145   :  { %v605_v27 = vsel %vm604_vm10, %v595_v20, %v603_v26  ;;  %v599_v28 = vpop.permute.xlu1 %598  ;;  %v685_v30 = vld [vmem:[#allocation3 + $0x60] sm:$0x33]  ;;  %v686_v31 = vld [vmem:[#allocation3 + $0x68] sm:$0x33]  ;;  %v630_v26 = vrot.slane %v1904_v23, 4 }
 0x146   :  { %v1908_v29 = vpop.permute.xlu0 %628  ;;  %612 = vst [vmem:[#allocation3 + $0x48] sm:$0x33] %v605_v27  ;;  %v602_v32 = vrot.slane %v599_v28, 4  ;;  %v1572_v36 = vcombine.high %v685_v30, %v685_v30  ;;  %v1574_v37 = vcombine.high %v686_v31, %v686_v31  ;;  %v1573_v38 = vcombine.low %v686_v31, %v686_v31 }
 0x147   :  { %v632_v35 = vrot.slane %v1908_v29, 4  ;;  %v1571_v39 = vcombine.low %v685_v30, %v685_v30 }
 0x148   :  { %v606_v40 = vsel %vm51_vm0, %v601_v25, %v602_v32  ;;  %v608_v41 = vsel %vm604_vm10, %v599_v28, %v602_v32  ;;  %1577 = vmatprep.subr.msk.bf16.mxu1 %vm423_vm5, %v1572_v36  ;;  %1579 = vmatprep.subr.msk.bf16.mxu0 %vm423_vm5, %v1574_v37  ;;  %v780_v43 = vsel %vm423_vm5, %v1573_v38, 0 }
 0x149   :  { %v638_v1 = vsel %vm634_vm13, %v1908_v29, %v632_v35  ;;  %v607_v42 = vsel %vm604_vm10, %v597_v22, %v606_v40  ;;  %614 = vst.msk [vmem:[#allocation3 + $0x58] sm:$0x33] %vm1847_vm7, %v608_v41  ;;  %v434_v45 = vpop.permute.xlu1 %433  ;;  %v774_v46 = vsel %vm423_vm5, %v1571_v39, 0  ;;  %843 = vmatpush1.bf16.msra.mxu0 %v780_v43 }
 0x14a   :  { %644 = vst.msk [vmem:[#allocation3 + $0x58] sm:$0xcc] %vm1910_vm14, %v638_v1  ;;  %v1929_v44 = vpop.permute.xlu0 %464  ;;  %613 = vst [vmem:[#allocation3 + $0x50] sm:$0x33] %v607_v42  ;;  %v439_v48 = vrot.slane %v434_v45, 4  ;;  %802 = vmatpush1.bf16.msra.mxu1 %v774_v46 }
 0x14b   :  { %v470_v37 = vrot.slane %v1929_v44, 4 }
 0x14c   :  { %v443_v49 = vsel %vm51_vm0, %v439_v48, %v440_v47 }
 0x14d   :  { %v445_v50 = vsel %vm444_vm15, %v434_v45, %v443_v49  ;;  %v438_v52 = vpop.permute.xlu1 %437 }
 0x14e   :  { %v469_v51 = vpop.permute.xlu0 %468  ;;  %452 = vst [vmem:[#allocation3] sm:$0x33] %v445_v50  ;;  %v441_v54 = vrot.slane %v438_v52, 4 }
 0x14f   :  { %v472_v53 = vrot.slane %v469_v51, 4 }
 0x150   :  { %v446_v62 = vsel %vm51_vm0, %v440_v47, %v441_v54  ;;  %v448_v63 = vsel %vm444_vm15, %v438_v52, %v441_v54 }
 0x151   :  { %v478_v61 = vsel %vm474_vm1, %v469_v51, %v472_v53  ;;  %v447_v3 = vsel %vm444_vm15, %v1896_v14, %v446_v62  ;;  %454 = vst.msk [vmem:[#allocation3 + $0x10] sm:$0x33] %vm1847_vm7, %v448_v63  ;;  %v495_v4 = vpop.permute.xlu1 %494  ;;  %v687_v62 = vld [vmem:[#allocation3 + $0x70] sm:$0x33] }
 0x152   :  { %487 = vst.msk [vmem:[#allocation3 + $0x10] sm:$0xcc] %vm1910_vm14, %v478_v61  ;;  %453 = vst [vmem:[#allocation3 + $0x8] sm:$0x33] %v447_v3  ;;  %v500_v6 = vrot.slane %v495_v4, 4  ;;  %v528_v24 = vpop.permute.xlu0 %527 }
 0x154   :  { %v503_v7 = vsel %vm51_vm0, %v500_v6, %v501_v5  ;;  %v1576_v6 = vcombine.high %v687_v62, %v687_v62 }
 0x155   :  { %v505_v8 = vsel %vm504_vm2, %v495_v4, %v503_v7  ;;  %v499_v9 = vpop.permute.xlu1 %498  ;;  %v1575_v7 = vcombine.low %v687_v62, %v687_v62 }
 0x156   :  { %512 = vst [vmem:[#allocation3 + $0x18] sm:$0x33] %v505_v8  ;;  %v502_v10 = vrot.slane %v499_v9, 4  ;;  %v532_v39 = vpop.permute.xlu0 %531  ;;  %v672_v8 = vld [vmem:[%s2227_s4] sm:$0xf] }
 0x157   :  { %v537_v42 = vrot.slane %v532_v39, 4  ;;  %v786_v33 = vsel %vm423_vm5, %v1575_v7, 0 }
 0x158   :  { %v506_v11 = vsel %vm51_vm0, %v501_v5, %v502_v10  ;;  %v508_v12 = vsel %vm504_vm2, %v499_v9, %v502_v10 }
 0x159   :  { %v507_v13 = vsel %vm504_vm2, %v1902_v21, %v506_v11  ;;  %514 = vst.msk [vmem:[#allocation3 + $0x28] sm:$0x33] %vm1847_vm7, %v508_v12  ;;  %v568_v14 = vpop.permute.xlu1 %567  ;;  %vm769_vm7 = vcmask 293888  }
 0x15a   :  { %513 = vst [vmem:[#allocation3 + $0x20] sm:$0x33] %v507_v13  ;;  %v573_v16 = vrot.slane %v568_v14, 4  ;;  %v1993_v13 = vpop.f32.mrf.mxu1 }
 0x15d   :  { %v570_v15 = vpop.permute.xlu1 %569 }
 0x15e   :  { %v574_v17 = vrot.slane %v570_v15, 4 }
 0x160   :  { %v576_v0 = vsel %vm51_vm0, %v573_v16, %v574_v17  ;;  %v1999_v16 = vpop.f32.mrf.mxu0 }
 0x161   :  { %v578_v19 = vsel %vm577_vm4, %v568_v14, %v576_v0  ;;  %v572_v2 = vpop.permute.xlu1 %571  ;;  %v1995_v14 = vpop.f32.mrf.mxu1 }
 0x162   :  { %585 = vst [vmem:[#allocation3 + $0x30] sm:$0xcc] %v578_v19  ;;  %v575_v20 = vrot.slane %v572_v2, 4  ;;  %v2003_v19 = vpop.f32.mrf.mxu0 }
 0x163   :  { %v692_v0 = vpop.permute.xlu0 %691 }
 0x164   :  { %v579_v22 = vsel %vm51_vm0, %v574_v17, %v575_v20  ;;  %v581_v21 = vsel %vm577_vm4, %v572_v2, %v575_v20 }
 0x165   :  { %v580_v18 = vsel %vm577_vm4, %v570_v15, %v579_v22  ;;  %587 = vst.msk [vmem:[#allocation3 + $0x40] sm:$0xcc] %vm1910_vm14, %v581_v21  ;;  %v627_v25 = vpop.permute.xlu1 %626  ;;  %v1997_v15 = vpop.f32.mrf.mxu1 }
 0x166   :  { %586 = vst [vmem:[#allocation3 + $0x38] sm:$0xcc] %v580_v18  ;;  %v631_v27 = vrot.slane %v627_v25, 4 }
 0x167   :  { %v2001_v17 = vpop.f32.mrf.mxu1 }
 0x168   :  { %v633_v28 = vsel %vm51_vm0, %v630_v26, %v631_v27  ;;  %v636_v30 = vsel %vm51_vm0, %v631_v27, %v632_v35 }
 0x169   :  { %v635_v31 = vsel %vm634_vm13, %v1904_v23, %v633_v28  ;;  %v637_v32 = vsel %vm634_vm13, %v627_v25, %v636_v30  ;;  %v467_v36 = vpop.permute.xlu1 %466  ;;  %v535_v23 = vrot.slane %v528_v24, 4 }
 0x16a   :  { %642 = vst [vmem:[#allocation3 + $0x48] sm:$0xcc] %v635_v31  ;;  %643 = vst [vmem:[#allocation3 + $0x50] sm:$0xcc] %v637_v32  ;;  %v471_v38 = vrot.slane %v467_v36, 4 }
 0x16c   :  { %v473_v40 = vsel %vm51_vm0, %v470_v37, %v471_v38  ;;  %v476_v41 = vsel %vm51_vm0, %v471_v38, %v472_v53  ;;  %v1668_v9 = vld [vmem:[#allocation3 + $0x44] ss:$24 sps:$4 sm:$0xff]   ;;  %v1670_v10 = vld [vmem:[#allocation3 + $0x40] ss:$24 sps:$4 sm:$0xff]  }
 0x16d   :  { %v475_v29 = vsel %vm474_vm1, %v1929_v44, %v473_v40  ;;  %v477_v35 = vsel %vm474_vm1, %v467_v36, %v476_v41  ;;  %v530_v1 = vpop.permute.xlu1 %529 }
 0x16e   :  { %482 = vst [vmem:[#allocation3] sm:$0xcc] %v475_v29  ;;  %483 = vst [vmem:[#allocation3 + $0x8] sm:$0xcc] %v477_v35  ;;  %v536_v43 = vrot.slane %v530_v1, 4 }
 0x170   :  { %v539_v45 = vsel %vm51_vm0, %v535_v23, %v536_v43  ;;  %v542_v46 = vsel %vm51_vm0, %v536_v43, %v537_v42 }
 0x171   :  { %v541_v47 = vsel %vm540_vm6, %v528_v24, %v539_v45  ;;  %v543_v48 = vsel %vm540_vm6, %v530_v1, %v542_v46  ;;  %v534_v49 = vpop.permute.xlu1 %533  ;;  %v1654_v50 = vld [vmem:[#allocation3 + $0x34] ss:$24 sps:$4 sm:$0xff]   ;;  %v1658_v52 = vld [vmem:[#allocation3 + $0x30] ss:$24 sps:$4 sm:$0xff]  }
 0x172   :  { %549 = vst [vmem:[#allocation3 + $0x18] sm:$0xcc] %v541_v47  ;;  %550 = vst [vmem:[#allocation3 + $0x20] sm:$0xcc] %v543_v48  ;;  %v538_v44 = vrot.slane %v534_v49, 4  ;;  %803 = vmatprep.subr.bf16.mxu1 %v1654_v50 }
 0x173   :  { %v1656_v51 = vld [vmem:[#allocation3 + $0x3c] ss:$24 sps:$4 sm:$0xff]   ;;  %v1659_v53 = vld [vmem:[#allocation3 + $0x38] ss:$24 sps:$4 sm:$0xff]   ;;  %804 = vmatpush1.bf16.msra.mxu1 %v1658_v52 }
 0x174   :  { %v544_v54 = vsel %vm51_vm0, %v537_v42, %v538_v44  ;;  %844 = vmatprep.subr.bf16.mxu0 %v1656_v51 }
 0x175   :  { %v545_v61 = vsel %vm540_vm6, %v532_v39, %v544_v54  ;;  %845 = vmatpush1.bf16.msra.mxu0 %v1659_v53 }
 0x176   :  { %551 = vst.msk [vmem:[#allocation3 + $0x28] sm:$0xcc] %vm1910_vm14, %v545_v61 }
 0x179   :  { %v1660_v63 = vld [vmem:[#allocation3 + $0x4] ss:$24 sps:$4 sm:$0xff]   ;;  %v1664_v4 = vld [vmem:[#allocation3] ss:$24 sps:$4 sm:$0xff]  }
 0x17a   :  { %v1662_v3 = vld [vmem:[#allocation3 + $0xc] ss:$24 sps:$4 sm:$0xff]   ;;  %v1665_v5 = vld [vmem:[#allocation3 + $0x8] ss:$24 sps:$4 sm:$0xff]   ;;  %805 = vmatprep.subr.bf16.mxu1 %v1660_v63 }
 0x17b   :  { %846 = vmatprep.subr.bf16.mxu0 %v1662_v3  ;;  %806 = vmatpush1.bf16.msra.mxu1 %v1664_v4 }
 0x17c   :  { %847 = vmatpush1.bf16.msra.mxu0 %v1665_v5  ;;  %1581 = vmatprep.subr.msk.bf16.mxu1 %vm423_vm5, %v1576_v6  ;;  %vm2033_vm5 = vmor %vm385_vm3, %vm51_vm0  ;;  %vm1385_vm3 = vcmask 588800  }
 0x17d   :  { %v1671_v11 = vld [vmem:[#allocation3 + $0x14] ss:$24 sps:$4 sm:$0xff]   ;;  %v1673_v12 = vld [vmem:[#allocation3 + $0x10] ss:$24 sps:$4 sm:$0xff]  }
 0x17e   :  { %1578 = vmatmul.mubr.msk.bf16.vlgmr.msra.gmra.mxu1 %vm769_vm7, %v672_v8 }
 0x17f   :  { %1580 = vmatmul.mubr.msk.bf16.vlgmr.msra.gmra.mxu0 %vm769_vm7, %v672_v8  ;;  %884 = vmatpush1.bf16.msra.mxu1 %v786_v33 }
 0x180   :  { %885 = vmatprep.subr.bf16.mxu1 %v1668_v9  ;;  %905 = vmatprep.mubr.bf16.mxu1 %v1714_v34 }
 0x181   :  { %1439 = vmatprep.mubr.bf16.mxu0 %v1714_v34 }
 0x183   :  { %886 = vmatpush1.bf16.msra.mxu1 %v1670_v10 }
 0x184   :  { %887 = vmatprep.subr.bf16.mxu1 %v1671_v11 }
 0x187   :  { %888 = vmatpush1.bf16.msra.mxu1 %v1673_v12 }
 0x18a   :  { %1582 = vmatmul.mubr.msk.bf16.vlgmr.msra.gmra.mxu1 %vm769_vm7, %v672_v8 }
 0x18b   :  { %1480 = vmatprep.mubr.bf16.mxu1 %v1714_v34 }
 0x23e   :  { %v825_v2 = vpop.f32.mrf.mxu1 }
 0x23f   :  { %v826_v20 = vadd.f32 %v825_v2, %v692_v0  ;;  %v866_v22 = vpop.f32.mrf.mxu0 }
 0x240   :  { %v867_v21 = vadd.f32 %v866_v22, %v692_v0  ;;  %v827_v24 = vpop.f32.mrf.mxu1 }
 0x241   :  { %v1583_v18 = vmul.f32 -1.442695, %v826_v20  ;;  %v828_v25 = vadd.f32 %v827_v24, %v692_v0  ;;  %v868_v26 = vpop.f32.mrf.mxu0 }
 0x242   :  { %v1585_v27 = vmul.f32 -1.442695, %v867_v21  ;;  %v869_v28 = vadd.f32 %v868_v26, %v692_v0  ;;  %v829_v30 = vpop.f32.mrf.mxu1  ;;  %v35_v26 = vld [vmem:[%s2229_s3] sm:$0xff] }
 0x243   :  { %1690 = vpow2.f32 %v1583_v18  ;;  %v1584_v31 = vmul.f32 -1.442695, %v828_v25  ;;  %v870_v32 = vpop.f32.mrf.mxu0 }
 0x244   :  { %1692 = vpow2.f32 %v1585_v27  ;;  %v1586_v36 = vmul.f32 -1.442695, %v869_v28  ;;  %v830_v37 = vpop.f32.mrf.mxu1 }
 0x245   :  { %1694 = vpow2.f32 %v1584_v31  ;;  %v871_v38 = vpop.f32.mrf.mxu0 }
 0x246   :  { %1696 = vpow2.f32 %v1586_v36 }
 0x24a   :  { %v907_v39 = vpop.f32.mrf.mxu1 }
 0x24b   :  { %v908_v40 = vadd.f32 %v907_v39, %v692_v0 }
 0x24c   :  { %v909_v41 = vpop.f32.mrf.mxu1 }
 0x24d   :  { %v1587_v29 = vmul.f32 -1.442695, %v908_v40  ;;  %v910_v35 = vadd.f32 %v909_v41, %v692_v0 }
 0x24e   :  { %v911_v1 = vpop.f32.mrf.mxu1 }
 0x24f   :  { %1698 = vpow2.f32 %v1587_v29  ;;  %v1588_v23 = vmul.f32 -1.442695, %v910_v35 }
 0x250   :  { %v1691_v42 = vpop.eup %1690  ;;  %v912_v43 = vpop.f32.mrf.mxu1 }
 0x251   :  { %v1693_v45 = vpop.eup %1692  ;;  %v932_v46 = vadd.f32 1.0, %v1691_v42  ;;  %1700 = vpow2.f32 %v1588_v23 }
 0x252   :  { %v1695_v47 = vpop.eup %1694  ;;  %v934_v48 = vadd.f32 1.0, %v1693_v45 }
 0x253   :  { %v1697_v49 = vpop.eup %1696  ;;  %1702 = vrcp.f32 %v932_v46  ;;  %v933_v50 = vadd.f32 1.0, %v1695_v47 }
 0x254   :  { %1704 = vrcp.f32 %v934_v48  ;;  %v935_v44 = vadd.f32 1.0, %v1697_v49 }
 0x255   :  { %1706 = vrcp.f32 %v933_v50 }
 0x256   :  { %1708 = vrcp.f32 %v935_v44 }
 0x25c   :  { %v1699_v51 = vpop.eup %1698 }
 0x25d   :  { %v936_v52 = vadd.f32 1.0, %v1699_v51 }
 0x25e   :  { %v1701_v53 = vpop.eup %1700 }
 0x25f   :  { %1710 = vrcp.f32 %v936_v52  ;;  %v937_v54 = vadd.f32 1.0, %v1701_v53 }
 0x260   :  { %v1703_v61 = vpop.eup %1702 }
 0x261   :  { %v1705_v62 = vpop.eup %1704  ;;  %v950_v63 = vmul.f32 %v1703_v61, %v826_v20  ;;  %1712 = vrcp.f32 %v937_v54 }
 0x262   :  { %v1707_v3 = vpop.eup %1706  ;;  %v952_v4 = vmul.f32 %v1705_v62, %v867_v21 }
 0x263   :  { %v1709_v5 = vpop.eup %1708  ;;  %v951_v6 = vmul.f32 %v1707_v3, %v828_v25  ;;  %v962_v8 = vmul.f32 %v950_v63, %v1825_v55  ;;  %v1244_v25 = vld [vmem:[%s2228_s7] sm:$0xff] }
 0x264   :  { %v953_v7 = vmul.f32 %v1709_v5, %v869_v28  ;;  %v964_v9 = vmul.f32 %v952_v4, %v1829_v57 }
 0x265   :  { %v963_v33 = vmul.f32 %v951_v6, %v1827_v56 }
 0x266   :  { %v965_v10 = vmul.f32 %v953_v7, %v1831_v58 }
 0x267   :  { %v2009_v11 = vpack.c.bf16 %v963_v33, %v962_v8 }
 0x268   :  { %v2011_v12 = vpack.c.bf16 %v965_v10, %v964_v9 }
 0x269   :  { %992 = vst [vmem:[#allocation2 + $0x4] sm:$0xff] %v2009_v11  ;;  %1196 = vrot.lane.b32.xlu1 %v2009_v11, %s1716_s1  ;;  %1144 = vrot.lane.b32.xlu0 %v2009_v11, %s1719_s13  ;;  %1109 = vst [vmem:[#allocation3 + $0x60] sm:$0xff] %v2009_v11 }
 0x26a   :  { %993 = vst [vmem:[#allocation2 + $0xc] sm:$0xff] %v2011_v12  ;;  %1110 = vst [vmem:[#allocation3 + $0x68] sm:$0xff] %v2011_v12 }
 0x26c   :  { %v1711_v55 = vpop.eup %1710 }
 0x26d   :  { %v954_v56 = vmul.f32 %v1711_v55, %v908_v40  ;;  %1198 = vrot.lane.b32.xlu1 %v2011_v12, %s1716_s1  ;;  %1170 = vrot.lane.b32.xlu0 %v2009_v11, %s1721_s17 }
 0x26e   :  { %v1713_v57 = vpop.eup %1712 }
 0x26f   :  { %v955_v58 = vmul.f32 %v1713_v57, %v910_v35  ;;  %v966_v0 = vmul.f32 %v954_v56, %v1833_v59 }
 0x270   :  { %v1048_v21 = vld [vmem:[#allocation2] sm:$0xff] }
 0x271   :  { %v967_v2 = vmul.f32 %v955_v58, %v1835_v60  ;;  %1146 = vrot.lane.b32.xlu1 %v2011_v12, %s1719_s13  ;;  %1118 = vrot.lane.b32.xlu0 %v2009_v11, %s1724_s19  ;;  %v1049_v59 = vld [vmem:[#allocation2 + $0x8] sm:$0xff] }
 0x273   :  { %v1633_v22 = vpack.c.bf16 %v967_v2, %v966_v0 }
 0x275   :  { %995 = vst.msk [vmem:[#allocation2 + $0x14] sm:$0xff] %vm2033_vm5, %v1633_v22  ;;  %1172 = vrot.lane.b32.xlu1 %v2011_v12, %s1721_s17  ;;  %1054 = vrot.lane.b32.xlu0 %v1048_v21, %s1720_s14 }
 0x279   :  { %1120 = vrot.lane.b32.xlu1 %v2011_v12, %s1724_s19  ;;  %1082 = vrot.lane.b32.xlu0 %v1048_v21, %s1723_s18 }
 0x27c   :  { %v1192_v60 = vld [vmem:[#allocation2 + $0x14] sm:$0xff] }
 0x27d   :  { %1056 = vrot.lane.b32.xlu1 %v1049_v59, %s1720_s14  ;;  %1002 = vrot.lane.b32.xlu0 %v1048_v21, %s1717_s12  ;;  %1111 = vst.msk [vmem:[#allocation3 + $0x70] sm:$0xff] %vm2033_vm5, %v1192_v60  ;;  %v1050_v24 = vld [vmem:[#allocation2 + $0x10] sm:$0xff]  ;;  %v1077_v18 = vld [vmem:[#allocation2 + $0x18] sm:$0xf] }
 0x281   :  { %1084 = vrot.lane.b32.xlu1 %v1049_v59, %s1723_s18  ;;  %1028 = vrot.lane.b32.xlu0 %v1048_v21, %s1722_s2 }
 0x285   :  { %1004 = vrot.lane.b32.xlu1 %v1049_v59, %s1717_s12  ;;  %1200 = vrot.lane.b32.xlu0 %v1192_v60, %s1716_s1 }
 0x289   :  { %1030 = vrot.lane.b32.xlu1 %v1049_v59, %s1722_s2  ;;  %1174 = vrot.lane.b32.xlu0 %v1192_v60, %s1721_s17 }
 0x28d   :  { %1148 = vrot.lane.b32.xlu1 %v1192_v60, %s1719_s13  ;;  %1058 = vrot.lane.b32.xlu0 %v1050_v24, %s1720_s14 }
 0x291   :  { %1122 = vrot.lane.b32.xlu1 %v1192_v60, %s1724_s19  ;;  %1088 = vrot.lane.b32.xlu0 %v1077_v18, %s1723_s18 }
 0x295   :  { %1086 = vrot.lane.b32.xlu1 %v1050_v24, %s1723_s18  ;;  %1032 = vrot.lane.b32.xlu0 %v1050_v24, %s1722_s2 }
 0x299   :  { %1006 = vrot.lane.b32.xlu1 %v1050_v24, %s1717_s12  ;;  %1247 = vperm.xlu0 %1645, %v1244_v25  }
 0x29d   :  { %38 = vperm.xlu1 %1646, %v35_v26  }
 0x2db   :  { %v1197_v27 = vpop.permute.xlu1 %1196  ;;  %v1145_v28 = vpop.permute.xlu0 %1144 }
 0x2dc   :  { %v1202_v32 = vrot.slane %v1197_v27, 4  ;;  %v1150_v41 = vrot.slane %v1145_v28, 4 }
 0x2df   :  { %v2068_v30 = vpop.permute.xlu1 %1198  ;;  %v1171_v31 = vpop.permute.xlu0 %1170 }
 0x2e0   :  { %v1203_v36 = vrot.slane %v2068_v30, 4  ;;  %v1176_v47 = vrot.slane %v1171_v31, 4 }
 0x2e2   :  { %v1205_v37 = vsel %vm51_vm0, %v1202_v32, %v1203_v36 }
 0x2e3   :  { %v1206_v38 = vsel %vm661_vm9, %v1197_v27, %v1205_v37  ;;  %v2073_v39 = vpop.permute.xlu1 %1146  ;;  %v1119_v40 = vpop.permute.xlu0 %1118 }
 0x2e4   :  { %v1151_v29 = vrot.slane %v2073_v39, 4  ;;  %v1617_v35 = vcombine.high %v1206_v38, %v1206_v38  ;;  %v1616_v1 = vcombine.low %v1206_v38, %v1206_v38  ;;  %v1124_v52 = vrot.slane %v1119_v40, 4 }
 0x2e6   :  { %v1153_v23 = vsel %vm51_vm0, %v1150_v41, %v1151_v29  ;;  %1622 = vmatprep.subr.msk.bf16.mxu0 %vm51_vm0, %v1617_v35  ;;  %v1390_v42 = vsel %vm51_vm0, %v1616_v1, 0 }
 0x2e7   :  { %v1154_v43 = vsel %vm604_vm10, %v1145_v28, %v1153_v23  ;;  %v2082_v45 = vpop.permute.xlu1 %1172  ;;  %v1055_v46 = vpop.permute.xlu0 %1054  ;;  %1414 = vmatpush1.bf16.msra.mxu0 %v1390_v42 }
 0x2e8   :  { %v1177_v48 = vrot.slane %v2082_v45, 4  ;;  %v1060_v5 = vrot.slane %v1055_v46, 4 }
 0x2ea   :  { %v1179_v49 = vsel %vm51_vm0, %v1176_v47, %v1177_v48 }
 0x2eb   :  { %v1180_v50 = vsel %vm634_vm13, %v1171_v31, %v1179_v49  ;;  %v2087_v44 = vpop.permute.xlu1 %1120  ;;  %v1083_v51 = vpop.permute.xlu0 %1082 }
 0x2ec   :  { %v1125_v53 = vrot.slane %v2087_v44, 4  ;;  %v1610_v54 = vcombine.low %v1154_v43, %v1180_v50  ;;  %v1611_v61 = vcombine.high %v1154_v43, %v1180_v50  ;;  %v1090_v56 = vrot.slane %v1083_v51, 4 }
 0x2ee   :  { %v1127_v62 = vsel %vm51_vm0, %v1124_v52, %v1125_v53  ;;  %1415 = vmatprep.subr.bf16.mxu0 %v1611_v61 }
 0x2ef   :  { %v1128_v63 = vsel %vm577_vm4, %v1119_v40, %v1127_v62  ;;  %v2094_v3 = vpop.permute.xlu1 %1056  ;;  %v1003_v4 = vpop.permute.xlu0 %1002  ;;  %1416 = vmatpush1.bf16.msra.mxu0 %v1610_v54 }
 0x2f0   :  { %v1061_v6 = vrot.slane %v2094_v3, 4  ;;  %v1604_v7 = vcombine.low %v2009_v11, %v1128_v63  ;;  %v1605_v8 = vcombine.high %v2009_v11, %v1128_v63  ;;  %v1008_v0 = vrot.slane %v1003_v4, 4 }
 0x2f2   :  { %v1063_v33 = vsel %vm51_vm0, %v1060_v5, %v1061_v6  ;;  %1417 = vmatprep.subr.bf16.mxu0 %v1605_v8 }
 0x2f3   :  { %v1064_v9 = vsel %vm504_vm2, %v1055_v46, %v1063_v33  ;;  %v2101_v10 = vpop.permute.xlu1 %1084  ;;  %v1029_v55 = vpop.permute.xlu0 %1028  ;;  %1418 = vmatpush1.bf16.msra.mxu0 %v1604_v7  ;;  %v2153_v7 = vld [vmem:[%s2230_s6] sm:$0xf] }
 0x2f4   :  { %1071 = vst [vmem:[#allocation3 + $0x30] sm:$0xff] %v1064_v9  ;;  %v1091_v57 = vrot.slane %v2101_v10, 4  ;;  %v1034_v27 = vrot.slane %v1029_v55, 4 }
 0x2f6   :  { %v1094_v58 = vsel %vm51_vm0, %v1090_v56, %v1091_v57 }
 0x2f7   :  { %v1095_v11 = vsel %vm540_vm6, %v1083_v51, %v1094_v58  ;;  %v2108_v2 = vpop.permute.xlu1 %1004  ;;  %v1201_v22 = vpop.permute.xlu0 %1200 }
 0x2f8   :  { %1103 = vst [vmem:[#allocation3 + $0x48] sm:$0xff] %v1095_v11  ;;  %v1009_v21 = vrot.slane %v2108_v2, 4  ;;  %v1204_v59 = vrot.slane %v1201_v22, 4  ;;  %v1598_v60 = vcombine.low %v1064_v9, %v1095_v11  ;;  %v1599_v24 = vcombine.high %v1064_v9, %v1095_v11 }
 0x2fa   :  { %v1011_v18 = vsel %vm51_vm0, %v1008_v0, %v1009_v21  ;;  %v1207_v25 = vsel %vm51_vm0, %v1203_v36, %v1204_v59  ;;  %v1209_v26 = vsel %vm661_vm9, %v1201_v22, %v1204_v59  ;;  %1419 = vmatprep.subr.bf16.mxu0 %v1599_v24 }
 0x2fb   :  { %v1012_v28 = vsel %vm444_vm15, %v1003_v4, %v1011_v18  ;;  %v1208_v31 = vsel %vm661_vm9, %v2068_v30, %v1207_v25  ;;  %1215 = vst.msk [vmem:[#allocation3 + $0xd0] sm:$0xff] %vm2033_vm5, %v1209_v26  ;;  %v2121_v32 = vpop.permute.xlu1 %1030  ;;  %v1175_v37 = vpop.permute.xlu0 %1174  ;;  %1420 = vmatpush1.bf16.msra.mxu0 %v1598_v60 }
 0x2fc   :  { %1019 = vst [vmem:[#allocation3] sm:$0xff] %v1012_v28  ;;  %v1035_v38 = vrot.slane %v2121_v32, 4  ;;  %v1178_v36 = vrot.slane %v1175_v37, 4  ;;  %v1619_v40 = vcombine.high %v1208_v31, %v1208_v31  ;;  %v1618_v41 = vcombine.low %v1208_v31, %v1208_v31 }
 0x2fe   :  { %v1037_v35 = vsel %vm51_vm0, %v1034_v27, %v1035_v38  ;;  %v1181_v1 = vsel %vm51_vm0, %v1177_v48, %v1178_v36  ;;  %v1183_v30 = vsel %vm634_vm13, %v1175_v37, %v1178_v36  ;;  %1624 = vmatprep.subr.msk.bf16.mxu1 %vm51_vm0, %v1619_v40  ;;  %v1396_v23 = vsel %vm51_vm0, %v1618_v41, 0 }
 0x2ff   :  { %v1038_v42 = vsel %vm474_vm1, %v1029_v55, %v1037_v35  ;;  %v1182_v43 = vsel %vm634_vm13, %v2082_v45, %v1181_v1  ;;  %1189 = vst.msk [vmem:[#allocation3 + $0xb8] sm:$0xff] %vm2033_vm5, %v1183_v30  ;;  %v1149_v46 = vpop.permute.xlu1 %1148  ;;  %v1059_v47 = vpop.permute.xlu0 %1058  ;;  %1455 = vmatpush1.bf16.msra.mxu1 %v1396_v23 }
 0x300   :  { %1045 = vst [vmem:[#allocation3 + $0x18] sm:$0xff] %v1038_v42  ;;  %v1152_v49 = vrot.slane %v1149_v46, 4  ;;  %v1062_v48 = vrot.slane %v1059_v47, 4  ;;  %v1592_v50 = vcombine.low %v1012_v28, %v1038_v42  ;;  %v1593_v51 = vcombine.high %v1012_v28, %v1038_v42 }
 0x302   :  { %v1155_v52 = vsel %vm51_vm0, %v1151_v29, %v1152_v49  ;;  %v1157_v54 = vsel %vm604_vm10, %v1149_v46, %v1152_v49  ;;  %v1065_v45 = vsel %vm51_vm0, %v1061_v6, %v1062_v48  ;;  %v1067_v61 = vsel %vm504_vm2, %v1059_v47, %v1062_v48  ;;  %1421 = vmatprep.subr.bf16.mxu0 %v1593_v51  ;;  %v1243_v62 = vld [vmem:[#allocation3 + $0xd0] sm:$0xff] }
 0x303   :  { %v1156_v63 = vsel %vm604_vm10, %v2073_v39, %v1155_v52  ;;  %1163 = vst.msk [vmem:[#allocation3 + $0xa0] sm:$0xff] %vm2033_vm5, %v1157_v54  ;;  %v1066_v4 = vsel %vm504_vm2, %v2094_v3, %v1065_v45  ;;  %1073 = vst.msk [vmem:[#allocation3 + $0x40] sm:$0xff] %vm2033_vm5, %v1067_v61  ;;  %v1123_v29 = vpop.permute.xlu1 %1122  ;;  %v1089_v5 = vpop.permute.xlu0 %1088  ;;  %1422 = vmatpush1.bf16.msra.mxu0 %v1592_v50  ;;  %v1621_v6 = vcombine.high %v1243_v62, %v1243_v62 }
 0x304   :  { %v1620_v8 = vcombine.low %v1243_v62, %v1243_v62  ;;  %1072 = vst [vmem:[#allocation3 + $0x38] sm:$0xff] %v1066_v4  ;;  %v1126_v39 = vrot.slane %v1123_v29, 4  ;;  %v1612_v33 = vcombine.low %v1156_v63, %v1182_v43  ;;  %v1613_v9 = vcombine.high %v1156_v63, %v1182_v43 }
 0x305   :  { %1626 = vmatprep.subr.msk.bf16.mxu0 %vm51_vm0, %v1621_v6  ;;  %v1093_v0 = vrot.slane %v1089_v5, 4 }
 0x306   :  { %v1402_v3 = vsel %vm51_vm0, %v1620_v8, 0  ;;  %v1129_v55 = vsel %vm51_vm0, %v1125_v53, %v1126_v39  ;;  %v1131_v56 = vsel %vm577_vm4, %v1123_v29, %v1126_v39  ;;  %1623 = vmatmul.mubr.msk.bf16.vlgmr.msra.gmra.mxu0 %vm1385_vm3, %v2153_v7  ;;  %1456 = vmatprep.subr.bf16.mxu1 %v1613_v9 }
 0x307   :  { %v1130_v58 = vsel %vm577_vm4, %v2087_v44, %v1129_v55  ;;  %1137 = vst.msk [vmem:[#allocation3 + $0x88] sm:$0xff] %vm2033_vm5, %v1131_v56  ;;  %v1087_v11 = vpop.permute.xlu1 %1086  ;;  %v1033_v22 = vpop.permute.xlu0 %1032  ;;  %1457 = vmatpush1.bf16.msra.mxu1 %v1612_v33  ;;  %1496 = vmatpush1.bf16.msra.mxu0 %v1402_v3 }
 0x308   :  { %v1092_v59 = vrot.slane %v1087_v11, 4  ;;  %v1036_v60 = vrot.slane %v1033_v22, 4  ;;  %v1606_v53 = vcombine.low %v2011_v12, %v1130_v58  ;;  %v1607_v24 = vcombine.high %v2011_v12, %v1130_v58  ;;  %1521 = vmatprep.mubr.bf16.mxu0 %v1714_v34 }
 0x30a   :  { %v1096_v44 = vsel %vm51_vm0, %v1091_v57, %v1092_v59  ;;  %v1098_v18 = vsel %vm51_vm0, %v1092_v59, %v1093_v0  ;;  %v1039_v25 = vsel %vm51_vm0, %v1035_v38, %v1036_v60  ;;  %v1041_v26 = vsel %vm474_vm1, %v1033_v22, %v1036_v60  ;;  %v1676_v27 = vld [vmem:[#allocation3 + $0xa0] ss:$24 sps:$4 sm:$0xff]   ;;  %v1678_v28 = vld [vmem:[#allocation3 + $0xa4] ss:$24 sps:$4 sm:$0xff]   ;;  %1458 = vmatprep.subr.bf16.mxu1 %v1607_v24 }
 0x30b   :  { %v1097_v12 = vsel %vm540_vm6, %v2101_v10, %v1096_v44  ;;  %v1099_v34 = vsel %vm540_vm6, %v1087_v11, %v1098_v18  ;;  %v1040_v31 = vsel %vm474_vm1, %v2121_v32, %v1039_v25  ;;  %1047 = vst.msk [vmem:[#allocation3 + $0x28] sm:$0xff] %vm2033_vm5, %v1041_v26  ;;  %v1007_v57 = vpop.permute.xlu1 %1006  ;;  %1459 = vmatpush1.bf16.msra.mxu1 %v1606_v53 }
 0x30c   :  { %1104 = vst [vmem:[#allocation3 + $0x50] sm:$0xff] %v1097_v12  ;;  %1105 = vst.msk [vmem:[#allocation3 + $0x58] sm:$0xff] %vm2033_vm5, %v1099_v34  ;;  %v1010_v37 = vrot.slane %v1007_v57, 4  ;;  %1497 = vmatprep.subr.bf16.mxu0 %v1678_v28  ;;  %v1600_v38 = vcombine.low %v1066_v4, %v1097_v12  ;;  %v1601_v36 = vcombine.high %v1066_v4, %v1097_v12 }
 0x30d   :  { %1046 = vst [vmem:[#allocation3 + $0x20] sm:$0xff] %v1040_v31  ;;  %1498 = vmatpush1.bf16.msra.mxu0 %v1676_v27 }
 0x30e   :  { %v1013_v10 = vsel %vm51_vm0, %v1009_v21, %v1010_v37  ;;  %v1015_v32 = vsel %vm444_vm15, %v1007_v57, %v1010_v37  ;;  %v1679_v40 = vld [vmem:[#allocation3 + $0x70] ss:$24 sps:$4 sm:$0xff]   ;;  %v1681_v41 = vld [vmem:[#allocation3 + $0x74] ss:$24 sps:$4 sm:$0xff]   ;;  %1460 = vmatprep.subr.bf16.mxu1 %v1601_v36  ;;  %vm1541_vm0 = vcmask 64512  }
 0x30f   :  { %v1014_v35 = vsel %vm444_vm15, %v2108_v2, %v1013_v10  ;;  %1021 = vst.msk [vmem:[#allocation3 + $0x10] sm:$0xff] %vm2033_vm5, %v1015_v32  ;;  %1461 = vmatpush1.bf16.msra.mxu1 %v1600_v38  ;;  %1499 = vmatprep.subr.bf16.mxu0 %v1681_v41 }
 0x310   :  { %1020 = vst [vmem:[#allocation3 + $0x8] sm:$0xff] %v1014_v35  ;;  %v1594_v1 = vcombine.low %v1014_v35, %v1040_v31  ;;  %v1595_v30 = vcombine.high %v1014_v35, %v1040_v31 }
 0x311   :  { %1500 = vmatpush1.bf16.msra.mxu0 %v1679_v40 }
 0x312   :  { %1462 = vmatprep.subr.bf16.mxu1 %v1595_v30 }
 0x313   :  { %v1682_v23 = vld [vmem:[#allocation3 + $0x40] ss:$24 sps:$4 sm:$0xff]   ;;  %v1684_v21 = vld [vmem:[#allocation3 + $0x44] ss:$24 sps:$4 sm:$0xff]   ;;  %1463 = vmatpush1.bf16.msra.mxu1 %v1594_v1 }
 0x314   :  { %1501 = vmatprep.subr.bf16.mxu0 %v1684_v21  ;;  %v1248_v43 = vpop.permute.xlu0 %1247 }
 0x315   :  { %1502 = vmatpush1.bf16.msra.mxu0 %v1682_v23 }
 0x316   :  { %v1687_v42 = vld [vmem:[#allocation3 + $0x14] ss:$24 sps:$4 sm:$0xff]   ;;  %1625 = vmatmul.mubr.msk.bf16.vlgmr.msra.gmra.mxu1 %vm1385_vm3, %v2153_v7  ;;  %v1685_v2 = vld [vmem:[#allocation3 + $0x10] ss:$24 sps:$4 sm:$0xff]  }
 0x317   :  { %1503 = vmatprep.subr.bf16.mxu0 %v1687_v42 }
 0x318   :  { %v39_v20 = vpop.permute.xlu1 %38 }
 0x319   :  { %1504 = vmatpush1.bf16.msra.mxu0 %v1685_v2  ;;  %v131_v47 = vadd.f32 %v1993_v13, %v39_v20  ;;  %v133_v51 = vadd.f32 %v1995_v14, %v39_v20  ;;  %v202_v13 = vadd.f32 %v1997_v15, %v39_v20  ;;  %v204_v14 = vadd.f32 %v2001_v17, %v39_v20 }
 0x31a   :  { %v273_v15 = vadd.f32 %v1999_v16, %v39_v20  ;;  %v275_v17 = vadd.f32 %v2003_v19, %v39_v20 }
 0x31c   :  { %1627 = vmatmul.mubr.msk.bf16.vlgmr.msra.gmra.mxu0 %vm1385_vm3, %v2153_v7 }
 0x3c6   :  { %v1441_v46 = vpop.f32.mrf.mxu0 }
 0x3c7   :  { %v1442_v49 = vadd.f32 %v1441_v46, %v1248_v43 }
 0x3c8   :  { %v1443_v48 = vpop.f32.mrf.mxu0 }
 0x3c9   :  { %v1530_v50 = vadd.f32 %v1442_v49, %v131_v47  ;;  %v1444_v52 = vadd.f32 %v1443_v48, %v1248_v43 }
 0x3ca   :  { %v1445_v54 = vpop.f32.mrf.mxu0 }
 0x3cb   :  { %1536 = vst [vmem:[%s2231_s8] sm:$0xff] %v1530_v50  ;;  %v1531_v45 = vadd.f32 %v1444_v52, %v133_v51 }
 0x3cc   :  { %v1446_v61 = vpop.f32.mrf.mxu0 }
 0x3cd   :  { %1537 = vst [vmem:[%s2231_s8 + $0x8] sm:$0xff] %v1531_v45 }
 0x3d6   :  { %v1482_v62 = vpop.f32.mrf.mxu1 }
 0x3d7   :  { %v1483_v63 = vadd.f32 %v1482_v62, %v1248_v43 }
 0x3d8   :  { %v1484_v4 = vpop.f32.mrf.mxu1 }
 0x3d9   :  { %v1532_v29 = vadd.f32 %v1483_v63, %v202_v13  ;;  %v1485_v5 = vadd.f32 %v1484_v4, %v1248_v43 }
 0x3da   :  { %v1486_v6 = vpop.f32.mrf.mxu1 }
 0x3db   :  { %1538 = vst [vmem:[%s2231_s8 + $0x10] sm:$0xff] %v1532_v29  ;;  %v1533_v7 = vadd.f32 %v1485_v5, %v204_v14 }
 0x3dc   :  { %v1487_v8 = vpop.f32.mrf.mxu1  ;;  %v1523_v39 = vpop.f32.mrf.mxu0 }
 0x3dd   :  { %1539 = vst [vmem:[%s2231_s8 + $0x18] sm:$0xff] %v1533_v7  ;;  %v1524_v33 = vadd.f32 %v1523_v39, %v1248_v43 }
 0x3de   :  { %v1525_v9 = vpop.f32.mrf.mxu0 }
 0x3df   :  { %v1534_v3 = vadd.f32 %v1524_v33, %v273_v15  ;;  %v1526_v55 = vadd.f32 %v1525_v9, %v1248_v43 }
 0x3e0   :  { %v1527_v56 = vpop.f32.mrf.mxu0 }
 0x3e1   :  { %1540 = vst [vmem:[%s2231_s8 + $0x20] sm:$0xff] %v1534_v3  ;;  %v1535_v58 = vadd.f32 %v1526_v55, %v275_v17 }
 0x3e2   :  { %v1528_v0 = vpop.f32.mrf.mxu0 }
 0x3e3   :  { %1542 = vst.msk [vmem:[%s2231_s8 + $0x28] sm:$0xff] %vm1541_vm0, %v1535_v58 }

</bundles_post_ra>
